<compile_context>
chip_gen: v7x
topology: tpu7x:2x2x1
jax: 0.10.0
libtpu: 0.0.40
codegen_flags: <defaults>
</compile_context>

<pallas_src>
import functools

import jax
import jax.numpy as jnp
from jax import lax
from jax.experimental import pallas as pl
from jax.experimental.pallas import tpu as pltpu

LANE = 128


def _round_up(x, m):
    return ((x + m - 1) // m) * m


def _prelu(x, alpha):
    return jnp.where(x > 0, x, alpha * x)


def _row_softmax(x, n_valid):
    """Softmax over the last dim restricted to the first `n_valid` lanes."""
    if n_valid == x.shape[-1]:
        m = jnp.max(x, axis=-1, keepdims=True)
        e = jnp.exp(x - m)
    else:
        col = lax.broadcasted_iota(jnp.int32, x.shape, x.ndim - 1)
        ok = col < n_valid
        m = jnp.max(jnp.where(ok, x, -jnp.inf), axis=-1, keepdims=True)
        e = jnp.where(ok, jnp.exp(x - m), 0.0)
    return e * pl.reciprocal(jnp.sum(e, axis=-1, keepdims=True), approx=True)


# ----------------------------- pass 1 kernel ------------------------------

def _emb_kernel(alpha_ref, feat_ref, w0_ref, b0_ref, w1_ref, b1_ref,
                w2_ref, b2_ref, emb_ref, esn_ref, *, d_out, n_real, tn):
    alpha = alpha_ref[0, 0]

    # MLP trunk (num_layers = 3: two hidden transforms + output linear).
    x = feat_ref[...]
    h = jnp.dot(x, w0_ref[...], preferred_element_type=jnp.float32) + b0_ref[...]
    h = _prelu(h, alpha)
    # TODO(synk): nn.Dropout(0.5) omitted (eval-mode identity, no RNG applied).
    h = jnp.dot(h, w1_ref[...], preferred_element_type=jnp.float32) + b1_ref[...]
    h = _prelu(h, alpha)
    emb = jnp.dot(h, w2_ref[...], preferred_element_type=jnp.float32) + b2_ref[...]

    # Zero padded rows (if any) so they contribute nothing downstream.
    row_ok = None
    if n_real % tn != 0:
        row = lax.broadcasted_iota(jnp.int32, emb.shape, 0) + pl.program_id(0) * tn
        row_ok = row < n_real
        emb = jnp.where(row_ok, emb, 0.0)

    emb_ref[...] = emb

    # getre_scale, folded:  es = softmax(emb);  diag(es@es.T) = sum(es^2, -1);
    # esn = es * rsqrt(diag)  =>  esn @ esn.T == re / sqrt(diag_i * diag_j).
    # (The reference's 1e-9 clamp is inert since diag >= 1/d_out > 0.)
    es = _row_softmax(emb, d_out)
    if row_ok is not None:
        es = jnp.where(row_ok, es, 0.0)
    rs = lax.rsqrt(jnp.maximum(jnp.sum(es * es, axis=-1, keepdims=True), 1e-18))
    esn_ref[...] = (es * rs).astype(jnp.bfloat16)


# ----------------------------- pass 2 kernel ------------------------------

def _prop_kernel(alpha_ref, beta_ref, esn_ref, emb_ref, lre_ref, out_ref,
                 stat_ref, *, d_out, n_real, n_pad, tn):
    phase = pl.program_id(0)
    b = pl.program_id(1)
    alpha = alpha_ref[0, 0]
    beta = beta_ref[0, 0]
    row0 = pl.multiple_of(b * tn, tn)

    # Normalised similarity rows for this block (bf16 MXU matmul, f32 acc),
    # diagonal zeroed with a predicate mask (no materialised eye).
    esn_blk = esn_ref[pl.ds(row0, tn), :]
    re = lax.dot_general(esn_blk, esn_ref[...], (((1,), (1,)), ((), ())),
                         preferred_element_type=jnp.float32)      # (tn, n_pad)
    grow = lax.broadcasted_iota(jnp.int32, re.shape, 0) + row0
    gcol = lax.broadcasted_iota(jnp.int32, re.shape, 1)
    is_diag = gcol == grow
    re = jnp.where(is_diag, 0.0, re)

    lr = beta * lre_ref[...] + (1.0 - beta) * re

    # ---- phase 0: global mean / max reduction over the blended matrix ----
    @pl.when(phase == 0)
    def _reduce():
        @pl.when(b == 0)
        def _init():
            stat_ref[0] = jnp.float32(0.0)
            stat_ref[1] = jnp.float32(-jnp.inf)

        if n_pad > n_real:
            valid = (grow < n_real) & (gcol < n_real)
            blk_sum = jnp.sum(jnp.where(valid, lr, 0.0))
            blk_max = jnp.max(jnp.where(valid, lr, -jnp.inf))
        else:
            blk_sum = jnp.sum(lr)
            blk_max = jnp.max(lr)
        stat_ref[0] = stat_ref[0] + blk_sum
        stat_ref[1] = jnp.maximum(stat_ref[1], blk_max)

    # ---- phase 1: rescale, add I, PReLU(+/-), propagate, write output ----
    @pl.when(phase == 1)
    def _apply():
        mean = stat_ref[0] * jnp.float32(1.0 / (n_real * n_real))
        mx = stat_ref[1]
        # Faithful to the PyTorch reference: divides by (max - mean) and by
        # mean with no epsilon guard.
        inv_pos = 1.0 / (mx - mean)
        inv_neg = 1.0 / mean
        lrc = lr - mean
        # negative branch: -((lrc + mean)/mean) == -(lr/mean)
        lrs = jnp.where(lrc > 0.0, lrc * inv_pos, -(lr * inv_neg))
        lrs = jnp.where(is_diag, lrs + 1.0, lrs)           # add_diag == x + I

        pos = lrs > 0.0                                    # shared PReLU sign mask
        al = alpha * lrs
        pos_sig = jnp.where(pos, lrs, al)                  # PReLU(lrs)
        neg_sig = jnp.where(pos, -al, -lrs)                # PReLU(-lrs)

        embb = emb_ref[...].astype(jnp.bfloat16)
        prod_p = jnp.dot(pos_sig.astype(jnp.bfloat16), embb,
                         preferred_element_type=jnp.float32)
        prod_n = jnp.dot(neg_sig.astype(jnp.bfloat16), embb,
                         preferred_element_type=jnp.float32)
        prop_p = _row_softmax(prod_p, d_out)
        prop_n = _row_softmax(prod_n, d_out)

        emb_blk = emb_ref[pl.ds(row0, tn), :]
        out_ref[...] = (prop_p - prop_n + emb_blk) * 0.5


# -------------------------------- wrapper ----------------------------------

def hete_propagate(feature, learnable_re, w0, b0, w1, b1, w2, b2,
                   alpha=0.25, beta=0.0, block_rows=256):
    n, in_dim = feature.shape
    hid = w0.shape[1]
    d_out = w2.shape[1]

    h_pad = _round_up(hid, LANE)
    d_pad = _round_up(d_out, LANE)
    tn = block_rows if n >= block_rows else _round_up(n, 16)
    n_pad = _round_up(n, tn)
    nb = n_pad // tn

    f32 = jnp.float32
    feat_p = jnp.zeros((n_pad, in_dim), f32).at[:n, :].set(feature.astype(f32))
    lre_p = jnp.zeros((n_pad, n_pad), f32).at[:n, :n].set(learnable_re.astype(f32))
    w0_p = jnp.zeros((in_dim, h_pad), f32).at[:, :hid].set(w0)
    b0_p = jnp.zeros((1, h_pad), f32).at[0, :hid].set(b0.reshape(-1))
    w1_p = jnp.zeros((h_pad, h_pad), f32).at[:hid, :hid].set(w1)
    b1_p = jnp.zeros((1, h_pad), f32).at[0, :hid].set(b1.reshape(-1))
    w2_p = jnp.zeros((h_pad, d_pad), f32).at[:hid, :d_out].set(w2)
    b2_p = jnp.zeros((1, d_pad), f32).at[0, :d_out].set(b2.reshape(-1))

    alpha_arr = jnp.full((1, 1), alpha, f32)
    beta_arr = jnp.full((1, 1), beta, f32)

    smem = pl.BlockSpec(memory_space=pltpu.MemorySpace.SMEM)
    vmem_cap = 64 * 1024 * 1024   # above 16/32 MiB scoped defaults, <= v7x VMEM

    # ---- pass 1: row-blocked MLP -> emb (f32) + normalised softmax rows ----
    emb, esn = pl.pallas_call(
        functools.partial(_emb_kernel, d_out=d_out, n_real=n, tn=tn),
        grid=(nb,),
        out_shape=(jax.ShapeDtypeStruct((n_pad, d_pad), jnp.float32),
                   jax.ShapeDtypeStruct((n_pad, d_pad), jnp.bfloat16)),
        in_specs=[smem,
                  pl.BlockSpec((tn, in_dim), lambda b: (b, 0)),
                  pl.BlockSpec((in_dim, h_pad), lambda b: (0, 0)),
                  pl.BlockSpec((1, h_pad), lambda b: (0, 0)),
                  pl.BlockSpec((h_pad, h_pad), lambda b: (0, 0)),
                  pl.BlockSpec((1, h_pad), lambda b: (0, 0)),
                  pl.BlockSpec((h_pad, d_pad), lambda b: (0, 0)),
                  pl.BlockSpec((1, d_pad), lambda b: (0, 0))],
        out_specs=(pl.BlockSpec((tn, d_pad), lambda b: (b, 0)),
                   pl.BlockSpec((tn, d_pad), lambda b: (b, 0))),
        compiler_params=pltpu.CompilerParams(
            dimension_semantics=("parallel",),      # row blocks independent
            vmem_limit_bytes=vmem_cap),
    )(alpha_arr, feat_p, w0_p, b0_p, w1_p, b1_p, w2_p, b2_p)

    # ---- pass 2: two-phase (reduce mean/max, then rescale + propagate) ----
    out_p = pl.pallas_call(
        functools.partial(_prop_kernel, d_out=d_out, n_real=n,
                          n_pad=n_pad, tn=tn),
        grid=(2, nb),
        out_shape=jax.ShapeDtypeStruct((n_pad, d_pad), jnp.float32),
        in_specs=[smem, smem,
                  pl.BlockSpec((n_pad, d_pad), lambda p, b: (0, 0)),  # esn (bf16)
                  pl.BlockSpec((n_pad, d_pad), lambda p, b: (0, 0)),  # emb (f32)
                  pl.BlockSpec((tn, n_pad), lambda p, b: (b, 0))],    # learnable_re rows
        out_specs=pl.BlockSpec((tn, d_pad), lambda p, b: (b, 0)),
        scratch_shapes=[pltpu.SMEM((2,), jnp.float32)],               # [sum, max]
        compiler_params=pltpu.CompilerParams(
            # phase axis carries SMEM/VMEM state across steps -> sequential.
            dimension_semantics=("arbitrary", "arbitrary"),
            vmem_limit_bytes=vmem_cap),
    )(alpha_arr, beta_arr, esn, emb, lre_p)

    return out_p[:n, :d_out]


# ------------------------------ param init ---------------------------------

def xavier_uniform(key, fan_in, fan_out, gain):
    bound = gain * jnp.sqrt(6.0 / (fan_in + fan_out))
    return jax.random.uniform(key, (fan_in, fan_out), jnp.float32,
                              minval=-bound, maxval=bound)


if __name__ == "__main__":
    # Module config (small, consistent with the PyTorch __init__).
    feat_dim = 8
    prop_steps = 3
    hidden_dim = 32
    output_dim = 16
    num_layers = 3            # 2 hidden transforms + final linear (hard-coded)
    beta = 0.3
    prelu_alpha = 0.25        # nn.PReLU default init
    N = 16                    # number of nodes

    in_dim = (prop_steps + 1) * feat_dim   # 32
    gain = float(jnp.sqrt(2.0))            # calculate_gain('relu')

    key = jax.random.PRNGKey(0)
    k_feat, k_re, k0, k1, k2 = jax.random.split(key, 5)

    feature = jax.random.normal(k_feat, (N, in_dim), jnp.float32)
    learnable_re = jax.random.normal(k_re, (N, N), jnp.float32)

    # Linear params (weights pre-transposed to [in, out]; biases zero).
    w0 = xavier_uniform(k0, in_dim, hidden_dim, gain)
    b0 = jnp.zeros((hidden_dim,), jnp.float32)
    w1 = xavier_uniform(k1, hidden_dim, hidden_dim, gain)
    b1 = jnp.zeros((hidden_dim,), jnp.float32)
    w2 = xavier_uniform(k2, hidden_dim, output_dim, gain)
    b2 = jnp.zeros((output_dim,), jnp.float32)

    out = hete_propagate(feature, learnable_re, w0, b0, w1, b1, w2, b2,
                         alpha=prelu_alpha, beta=beta)
    out = jax.block_until_ready(out)
    assert out.shape == (N, output_dim)
    assert bool(jnp.all(jnp.isfinite(out)))
    print("KERNEL_OK")
</pallas_src>

<mosaic_0001>
module attributes {stable_mosaic.version = 11 : i64} {
  func.func @_emb_kernel(%arg0: i32, %arg1: memref<1x1xf32, #tpu.memory_space<smem>>, %arg2: memref<16x32xf32, #tpu.memory_space<vmem>>, %arg3: memref<32x128xf32, #tpu.memory_space<vmem>>, %arg4: memref<1x128xf32, #tpu.memory_space<vmem>>, %arg5: memref<128x128xf32, #tpu.memory_space<vmem>>, %arg6: memref<1x128xf32, #tpu.memory_space<vmem>>, %arg7: memref<128x128xf32, #tpu.memory_space<vmem>>, %arg8: memref<1x128xf32, #tpu.memory_space<vmem>>, %arg9: memref<16x128xf32, #tpu.memory_space<vmem>>, %arg10: memref<16x128xbf16, #tpu.memory_space<vmem>>) attributes {dimension_semantics = [#tpu.dimension_semantics<parallel>], iteration_bounds = array<i64: 1>, scalar_prefetch = 0 : i64, scratch_operands = 0 : i64, tpu.core_type = #tpu.core_type<tc>, window_params = [{transform_indices = @transform_0, window_bounds = array<i64: 1, 1>}, {transform_indices = @transform_1, window_bounds = array<i64: 16, 32>}, {pipeline_mode = #tpu.pipeline_mode<synchronous>, transform_indices = @transform_2, window_bounds = array<i64: 32, 128>}, {pipeline_mode = #tpu.pipeline_mode<synchronous>, transform_indices = @transform_3, window_bounds = array<i64: 1, 128>}, {pipeline_mode = #tpu.pipeline_mode<synchronous>, transform_indices = @transform_4, window_bounds = array<i64: 128, 128>}, {pipeline_mode = #tpu.pipeline_mode<synchronous>, transform_indices = @transform_5, window_bounds = array<i64: 1, 128>}, {pipeline_mode = #tpu.pipeline_mode<synchronous>, transform_indices = @transform_6, window_bounds = array<i64: 128, 128>}, {pipeline_mode = #tpu.pipeline_mode<synchronous>, transform_indices = @transform_7, window_bounds = array<i64: 1, 128>}, {transform_indices = @transform_8, window_bounds = array<i64: 16, 128>}, {transform_indices = @transform_9, window_bounds = array<i64: 16, 128>}]} {
    %c0 = arith.constant 0 : index
    %c0_0 = arith.constant 0 : index
    %0 = memref.load %arg1[%c0, %c0_0] : memref<1x1xf32, #tpu.memory_space<smem>>
    %c0_1 = arith.constant 0 : index
    %c0_2 = arith.constant 0 : index
    %1 = vector.load %arg2[%c0_1, %c0_2] : memref<16x32xf32, #tpu.memory_space<vmem>>, vector<16x32xf32>
    %c0_3 = arith.constant 0 : index
    %c0_4 = arith.constant 0 : index
    %2 = vector.load %arg3[%c0_3, %c0_4] : memref<32x128xf32, #tpu.memory_space<vmem>>, vector<32x128xf32>
    %cst = arith.constant dense<0.000000e+00> : vector<16x128xf32>
    %3 = tpu.matmul %1, %2, %cst {dimension_numbers = #tpu.dot_dimension_numbers<[1], [0], [0], [1], [0, 0, 1, 1], [], []>} : vector<16x32xf32>, vector<32x128xf32>, vector<16x128xf32> -> vector<16x128xf32>
    %c0_5 = arith.constant 0 : index
    %c0_6 = arith.constant 0 : index
    %4 = vector.load %arg4[%c0_5, %c0_6] : memref<1x128xf32, #tpu.memory_space<vmem>>, vector<1x128xf32>
    %5 = vector.broadcast %4 : vector<1x128xf32> to vector<16x128xf32>
    %6 = arith.addf %3, %5 : vector<16x128xf32>
    %cst_7 = arith.constant 0.000000e+00 : f32
    %7 = vector.broadcast %cst_7 : f32 to vector<16x128xf32>
    %8 = arith.cmpf ogt, %6, %7 : vector<16x128xf32>
    %9 = vector.broadcast %0 : f32 to vector<16x128xf32>
    %10 = arith.mulf %9, %6 : vector<16x128xf32>
    %11 = arith.select %8, %6, %10 : vector<16x128xi1>, vector<16x128xf32>
    %c0_8 = arith.constant 0 : index
    %c0_9 = arith.constant 0 : index
    %12 = vector.load %arg5[%c0_8, %c0_9] : memref<128x128xf32, #tpu.memory_space<vmem>>, vector<128x128xf32>
    %cst_10 = arith.constant dense<0.000000e+00> : vector<16x128xf32>
    %13 = tpu.matmul %11, %12, %cst_10 {dimension_numbers = #tpu.dot_dimension_numbers<[1], [0], [0], [1], [0, 0, 1, 1], [], []>} : vector<16x128xf32>, vector<128x128xf32>, vector<16x128xf32> -> vector<16x128xf32>
    %c0_11 = arith.constant 0 : index
    %c0_12 = arith.constant 0 : index
    %14 = vector.load %arg6[%c0_11, %c0_12] : memref<1x128xf32, #tpu.memory_space<vmem>>, vector<1x128xf32>
    %15 = vector.broadcast %14 : vector<1x128xf32> to vector<16x128xf32>
    %16 = arith.addf %13, %15 : vector<16x128xf32>
    %cst_13 = arith.constant 0.000000e+00 : f32
    %17 = vector.broadcast %cst_13 : f32 to vector<16x128xf32>
    %18 = arith.cmpf ogt, %16, %17 : vector<16x128xf32>
    %19 = vector.broadcast %0 : f32 to vector<16x128xf32>
    %20 = arith.mulf %19, %16 : vector<16x128xf32>
    %21 = arith.select %18, %16, %20 : vector<16x128xi1>, vector<16x128xf32>
    %c0_14 = arith.constant 0 : index
    %c0_15 = arith.constant 0 : index
    %22 = vector.load %arg7[%c0_14, %c0_15] : memref<128x128xf32, #tpu.memory_space<vmem>>, vector<128x128xf32>
    %cst_16 = arith.constant dense<0.000000e+00> : vector<16x128xf32>
    %23 = tpu.matmul %21, %22, %cst_16 {dimension_numbers = #tpu.dot_dimension_numbers<[1], [0], [0], [1], [0, 0, 1, 1], [], []>} : vector<16x128xf32>, vector<128x128xf32>, vector<16x128xf32> -> vector<16x128xf32>
    %c0_17 = arith.constant 0 : index
    %c0_18 = arith.constant 0 : index
    %24 = vector.load %arg8[%c0_17, %c0_18] : memref<1x128xf32, #tpu.memory_space<vmem>>, vector<1x128xf32>
    %25 = vector.broadcast %24 : vector<1x128xf32> to vector<16x128xf32>
    %26 = arith.addf %23, %25 : vector<16x128xf32>
    %c0_19 = arith.constant 0 : index
    %c0_20 = arith.constant 0 : index
    %27 = vector.load %arg9[%c0_19, %c0_20] : memref<16x128xf32, #tpu.memory_space<vmem>>, vector<16x128xf32>
    tpu.vector_store %arg9[%c0_19, %c0_20], %26 {strides = array<i32>} : memref<16x128xf32, #tpu.memory_space<vmem>>, vector<16x128xf32>,
    %28 = tpu.iota {dimensions = array<i32: 1>} : vector<16x128xi32>
    %c16_i32 = arith.constant 16 : i32
    %29 = vector.broadcast %c16_i32 : i32 to vector<16x128xi32>
    %30 = arith.cmpi slt, %28, %29 : vector<16x128xi32>
    %cst_21 = arith.constant 0xFF800000 : f32
    %31 = vector.broadcast %cst_21 : f32 to vector<16x128xf32>
    %32 = arith.select %30, %26, %31 : vector<16x128xi1>, vector<16x128xf32>
    %cst_22 = arith.constant dense<0xFF800000> : vector<16xf32>
    %33 = vector.multi_reduction <maximumf>, %32, %cst_22 [1] : vector<16x128xf32> to vector<16xf32>
    %34 = vector.shape_cast %33 : vector<16xf32> to vector<16x1xf32>
    %35 = vector.broadcast %34 : vector<16x1xf32> to vector<16x128xf32>
    %36 = arith.subf %26, %35 : vector<16x128xf32>
    %37 = math.exp %36 : vector<16x128xf32>
    %cst_23 = arith.constant 0.000000e+00 : f32
    %38 = vector.broadcast %cst_23 : f32 to vector<16x128xf32>
    %39 = arith.select %30, %37, %38 : vector<16x128xi1>, vector<16x128xf32>
    %cst_24 = arith.constant dense<0.000000e+00> : vector<16xf32>
    %40 = vector.multi_reduction <add>, %39, %cst_24 [1] : vector<16x128xf32> to vector<16xf32>
    %41 = vector.shape_cast %40 : vector<16xf32> to vector<16x1xf32>
    %42 = tpu.reciprocal %41 {approx = true} : vector<16x1xf32> -> vector<16x1xf32>
    %43 = vector.broadcast %42 : vector<16x1xf32> to vector<16x128xf32>
    %44 = arith.mulf %39, %43 : vector<16x128xf32>
    %45 = arith.mulf %44, %44 : vector<16x128xf32>
    %cst_25 = arith.constant dense<0.000000e+00> : vector<16xf32>
    %46 = vector.multi_reduction <add>, %45, %cst_25 [1] : vector<16x128xf32> to vector<16xf32>
    %47 = vector.shape_cast %46 : vector<16xf32> to vector<16x1xf32>
    %cst_26 = arith.constant 1.000000e-18 : f32
    %48 = vector.broadcast %cst_26 : f32 to vector<16x1xf32>
    %49 = arith.maximumf %47, %48 : vector<16x1xf32>
    %50 = math.rsqrt %49 : vector<16x1xf32>
    %51 = vector.broadcast %50 : vector<16x1xf32> to vector<16x128xf32>
    %52 = arith.mulf %44, %51 : vector<16x128xf32>
    %53 = arith.truncf %52 : vector<16x128xf32> to vector<16x128xbf16>
    %c0_27 = arith.constant 0 : index
    %c0_28 = arith.constant 0 : index
    %54 = vector.load %arg10[%c0_27, %c0_28] : memref<16x128xbf16, #tpu.memory_space<vmem>>, vector<16x128xbf16>
    tpu.vector_store %arg10[%c0_27, %c0_28], %53 {strides = array<i32>} : memref<16x128xbf16, #tpu.memory_space<vmem>>, vector<16x128xbf16>,
    return
  }
  func.func @transform_0(%arg0: i32) -> (i32, i32) {
    %c0_i32 = arith.constant 0 : i32
    %c0_i32_0 = arith.constant 0 : i32
    %c0_i32_1 = arith.constant 0 : i32
    return %c0_i32, %c0_i32_0 : i32, i32
  }
  func.func @transform_1(%arg0: i32) -> (i32, i32) {
    %c0_i32 = arith.constant 0 : i32
    %c0_i32_0 = arith.constant 0 : i32
    return %arg0, %c0_i32 : i32, i32
  }
  func.func @transform_2(%arg0: i32) -> (i32, i32) {
    %c0_i32 = arith.constant 0 : i32
    %c0_i32_0 = arith.constant 0 : i32
    %c0_i32_1 = arith.constant 0 : i32
    return %c0_i32, %c0_i32_0 : i32, i32
  }
  func.func @transform_3(%arg0: i32) -> (i32, i32) {
    %c0_i32 = arith.constant 0 : i32
    %c0_i32_0 = arith.constant 0 : i32
    %c0_i32_1 = arith.constant 0 : i32
    return %c0_i32, %c0_i32_0 : i32, i32
  }
  func.func @transform_4(%arg0: i32) -> (i32, i32) {
    %c0_i32 = arith.constant 0 : i32
    %c0_i32_0 = arith.constant 0 : i32
    %c0_i32_1 = arith.constant 0 : i32
    return %c0_i32, %c0_i32_0 : i32, i32
  }
  func.func @transform_5(%arg0: i32) -> (i32, i32) {
    %c0_i32 = arith.constant 0 : i32
    %c0_i32_0 = arith.constant 0 : i32
    %c0_i32_1 = arith.constant 0 : i32
    return %c0_i32, %c0_i32_0 : i32, i32
  }
  func.func @transform_6(%arg0: i32) -> (i32, i32) {
    %c0_i32 = arith.constant 0 : i32
    %c0_i32_0 = arith.constant 0 : i32
    %c0_i32_1 = arith.constant 0 : i32
    return %c0_i32, %c0_i32_0 : i32, i32
  }
  func.func @transform_7(%arg0: i32) -> (i32, i32) {
    %c0_i32 = arith.constant 0 : i32
    %c0_i32_0 = arith.constant 0 : i32
    %c0_i32_1 = arith.constant 0 : i32
    return %c0_i32, %c0_i32_0 : i32, i32
  }
  func.func @transform_8(%arg0: i32) -> (i32, i32) {
    %c0_i32 = arith.constant 0 : i32
    %c0_i32_0 = arith.constant 0 : i32
    return %arg0, %c0_i32 : i32, i32
  }
  func.func @transform_9(%arg0: i32) -> (i32, i32) {
    %c0_i32 = arith.constant 0 : i32
    %c0_i32_0 = arith.constant 0 : i32
    return %arg0, %c0_i32 : i32, i32
  }
}

</mosaic_0001>

<bundles_post_ra>
// kernel: tpu_custom_call.1
= control target key start
LH: loop header
LB: loop body
LE: loop exit
PB: predicated region body
PF: predicated region fallthrough
CT: control target
= control target key end

     0   :  { %16 = vsyncpa [#allocation4], 0  ;;  %s1166_s0 = inlined_call_operand.<no memory space> [shape: f32[1,1], index: 0, kind: input, shape index: {}]   ;;  %s1167_s1 = inlined_call_operand.hbm [shape: f32[16,32], index: 1, kind: input, shape index: {}]   ;;  %s1168_s2 = inlined_call_operand.hbm [shape: f32[32,128], index: 2, kind: input, shape index: {}]   ;;  %s1169_s3 = inlined_call_operand.hbm [shape: f32[1,128], index: 3, kind: input, shape index: {}]   ;;  %s1170_s4 = inlined_call_operand.hbm [shape: f32[128,128], index: 4, kind: input, shape index: {}]   ;;  %s1171_s5 = inlined_call_operand.hbm [shape: f32[1,128], index: 5, kind: input, shape index: {}]   ;;  %s1172_s6 = inlined_call_operand.hbm [shape: f32[128,128], index: 6, kind: input, shape index: {}]   ;;  %s1173_s7 = inlined_call_operand.hbm [shape: f32[1,128], index: 7, kind: input, shape index: {}]   ;;  %s1174_s8 = inlined_call_operand.hbm [shape: f32[16,128], index: 8, kind: output, shape index: {0}]   ;;  %s1175_s9 = inlined_call_operand.hbm [shape: bf16[16,128], index: 9, kind: output, shape index: {1}]  }
   0x1   :  { %17 = vsyncpa [#allocation7], 0 }
   0x2   :  { %18 = vsyncpa [#allocation10], 0 }
   0x3   :  { %19 = vsyncpa [#allocation13], 0 }
   0x4   :  { %20 = vsyncpa [#allocation5], 0 }
   0x5   :  { %21 = vsyncpa [#allocation17], 0  ;;  %s957_s30 = smov [#allocation6]   ;;  %s958_s11 = smov [#allocation9]  }
   0x6   :  { %s41_s10 = sshll.u32 %s957_s30, 4  ;;  %s63_s12 = sshll.u32 %s958_s11, 4  ;;  %s42_s10 = int_to_ptr.vmem [resolvable:$true] %s41_s10  ;;  %s1020_s12 = int_to_ptr.vmem [resolvable:$true] %s63_s12 }
   0x7   :  { %s747_s15 = scalar_lea.hbm %s1168_s2, 512 }
   0x8   :  { %p748_p0 = scmp.ne.s32.totalorder %s1168_s2, %s747_s15  ;;  %p751_p1 = scmp.lt.u32.totalorder %s747_s15, %s1168_s2 }
   0xa   :  { %p753_p2 = pnand %p751_p1, %p748_p0 }
   0xc   :  { %756 = shalt.err (!%p753_p2)
}
   0xd   :  { %s757_s20 = scalar_lea.vmem %s42_s10, 512  ;;  %p762_p4 = scmp.lt.s32.totalorder %s42_s10, %s42_s10 }
   0xe   :  { %p758_p3 = scmp.ne.s32.totalorder %s42_s10, %s757_s20  ;;  %p763_p5 = scmp.lt.s32.totalorder %s757_s20, %s757_s20 }
  0x10   :  { %p764_p6 = por %p763_p5, %p762_p4 }
  0x12   :  { %p765_p7 = pnand %p764_p6, %p758_p3 }
  0x14   :  { %768 = shalt.err (!%p765_p7)
}
  0x15   :  { %s959_s21 = smov 128   ;;  %s960_s22 = smov 8  }
  0x16   :  { %47 = dma.hbm_to_vmem [thread:$0]  %s1168_s2, 512, %s42_s10, [#allocation7], %s959_s21, %s959_s21, %s960_s22  }
  0x17   :  { %s769_s27 = scalar_lea.hbm %s1170_s4, 2048 }
  0x18   :  { %p770_p8 = scmp.ne.s32.totalorder %s1170_s4, %s769_s27  ;;  %p773_p9 = scmp.lt.u32.totalorder %s769_s27, %s1170_s4 }
  0x1a   :  { %p775_p10 = pnand %p773_p9, %p770_p8 }
  0x1c   :  { %778 = shalt.err (!%p775_p10)
}
  0x1d   :  { %s779_s13 = scalar_lea.vmem %s1020_s12, 2048  ;;  %p784_p12 = scmp.lt.s32.totalorder %s1020_s12, %s1020_s12 }
  0x1e   :  { %p780_p11 = scmp.ne.s32.totalorder %s1020_s12, %s779_s13  ;;  %p785_p13 = scmp.lt.s32.totalorder %s779_s13, %s779_s13 }
  0x20   :  { %p786_p0 = por %p785_p13, %p784_p12 }
  0x22   :  { %p787_p1 = pnand %p786_p0, %p780_p11 }
  0x24   :  { %790 = shalt.err (!%p787_p1)
}
  0x25   :  { %69 = dma.hbm_to_vmem [thread:$0]  %s1170_s4, 2048, %s1020_s12, [#allocation10], %s959_s21, %s959_s21, %s960_s22  }
  0x26   :  { %s961_s14 = smov [#allocation12]   ;;  %s962_s16 = smov [#allocation3]  }
  0x27   :  { %s85_s15 = sshll.u32 %s961_s14, 4  ;;  %s29_s17 = sshll.u32 %s962_s16, 4  ;;  %s86_s15 = int_to_ptr.vmem [resolvable:$true] %s85_s15  ;;  %s1057_s17 = int_to_ptr.vmem [resolvable:$true] %s29_s17 }
  0x28   :  { %s791_s20 = scalar_lea.hbm %s1172_s6, 2048 }
  0x29   :  { %p792_p2 = scmp.ne.s32.totalorder %s1172_s6, %s791_s20  ;;  %p795_p3 = scmp.lt.u32.totalorder %s791_s20, %s1172_s6 }
  0x2b   :  { %p797_p4 = pnand %p795_p3, %p792_p2 }
  0x2d   :  { %800 = shalt.err (!%p797_p4)
}
  0x2e   :  { %s801_s4 = scalar_lea.vmem %s86_s15, 2048  ;;  %p806_p6 = scmp.lt.s32.totalorder %s86_s15, %s86_s15 }
  0x2f   :  { %p802_p5 = scmp.ne.s32.totalorder %s86_s15, %s801_s4  ;;  %p807_p7 = scmp.lt.s32.totalorder %s801_s4, %s801_s4 }
  0x31   :  { %p808_p8 = por %p807_p7, %p806_p6 }
  0x33   :  { %p809_p9 = pnand %p808_p8, %p802_p5 }
  0x35   :  { %812 = shalt.err (!%p809_p9)
}
  0x36   :  { %91 = dma.hbm_to_vmem [thread:$0]  %s1172_s6, 2048, %s86_s15, [#allocation13], %s959_s21, %s959_s21, %s960_s22  }
  0x37   :  { %s813_s30 = scalar_lea.hbm %s1167_s1, 256 }
  0x38   :  { %p814_p10 = scmp.ne.s32.totalorder %s1167_s1, %s813_s30  ;;  %p817_p11 = scmp.lt.u32.totalorder %s813_s30, %s1167_s1 }
  0x3a   :  { %p819_p12 = pnand %p817_p11, %p814_p10 }
  0x3c   :  { %822 = shalt.err (!%p819_p12)
}
  0x3d   :  { %s823_s14 = scalar_lea.vmem %s1057_s17, 256  ;;  %p828_p0 = scmp.lt.s32.totalorder %s1057_s17, %s1057_s17 }
  0x3e   :  { %p824_p13 = scmp.ne.s32.totalorder %s1057_s17, %s823_s14  ;;  %p829_p1 = scmp.lt.s32.totalorder %s823_s14, %s823_s14 }
  0x40   :  { %p830_p2 = por %p829_p1, %p828_p0 }
  0x42   :  { %p831_p3 = pnand %p830_p2, %p824_p13 }
  0x44   :  { %834 = shalt.err (!%p831_p3)
}
  0x45   :  { %35 = dma.hbm_to_vmem [thread:$0]  %s1167_s1, 256, %s1057_s17, [#allocation4], %s959_s21, %s959_s21, %s960_s22  }
  0x46   :  { %s963_s16 = smov [#allocation8]   ;;  %s964_s19 = smov [#allocation11]  }
  0x47   :  { %s54_s18 = sshll.u32 %s963_s16, 4  ;;  %s76_s20 = sshll.u32 %s964_s19, 4  ;;  %s55_s18 = int_to_ptr.vmem [resolvable:$true] %s54_s18  ;;  %s77_s20 = int_to_ptr.vmem [resolvable:$true] %s76_s20 }
  0x48   :  { %s835_s25 = scalar_lea.hbm %s1169_s3, 16 }
  0x49   :  { %p836_p4 = scmp.ne.s32.totalorder %s1169_s3, %s835_s25  ;;  %p839_p5 = scmp.lt.u32.totalorder %s835_s25, %s1169_s3 }
  0x4b   :  { %p841_p6 = pnand %p839_p5, %p836_p4 }
  0x4d   :  { %844 = shalt.err (!%p841_p6)
}
  0x4e   :  { %s845_s1 = scalar_lea.vmem %s55_s18, 16  ;;  %s849_s17 = scalar_lea.vmem %s55_s18, 32 }
  0x4f   :  { %p846_p7 = scmp.ne.s32.totalorder %s55_s18, %s845_s1  ;;  %p850_p8 = scmp.lt.s32.totalorder %s55_s18, %s55_s18 }
  0x50   :  { %p851_p9 = scmp.lt.s32.totalorder %s849_s17, %s845_s1 }
  0x52   :  { %p852_p10 = por %p851_p9, %p850_p8 }
  0x54   :  { %p853_p11 = pnand %p852_p10, %p846_p7 }
  0x56   :  { %856 = shalt.err (!%p853_p11)
}
  0x57   :  { %57 = dma.hbm_to_vmem [thread:$0]  %s1169_s3, 16, %s55_s18, [#allocation7]  }
  0x58   :  { %s857_s13 = scalar_lea.hbm %s1171_s5, 16 }
  0x59   :  { %p858_p12 = scmp.ne.s32.totalorder %s1171_s5, %s857_s13  ;;  %p861_p13 = scmp.lt.u32.totalorder %s857_s13, %s1171_s5 }
  0x5b   :  { %p863_p0 = pnand %p861_p13, %p858_p12 }
  0x5d   :  { %866 = shalt.err (!%p863_p0)
}
  0x5e   :  { %s867_s15 = scalar_lea.vmem %s77_s20, 16  ;;  %s871_s16 = scalar_lea.vmem %s77_s20, 32 }
  0x5f   :  { %p868_p1 = scmp.ne.s32.totalorder %s77_s20, %s867_s15  ;;  %p872_p2 = scmp.lt.s32.totalorder %s77_s20, %s77_s20 }
  0x60   :  { %p873_p3 = scmp.lt.s32.totalorder %s871_s16, %s867_s15 }
  0x62   :  { %p874_p4 = por %p873_p3, %p872_p2 }
  0x64   :  { %p875_p5 = pnand %p874_p4, %p868_p1 }
  0x66   :  { %878 = shalt.err (!%p875_p5)
}
  0x67   :  { %79 = dma.hbm_to_vmem [thread:$0]  %s1171_s5, 16, %s77_s20, [#allocation10]  }
  0x68   :  { %s965_s19 = smov [#allocation14]   ;;  %s879_s26 = scalar_lea.hbm %s1173_s7, 16 }
  0x69   :  { %s98_s23 = sshll.u32 %s965_s19, 4  ;;  %p880_p6 = scmp.ne.s32.totalorder %s1173_s7, %s879_s26  ;;  %s99_s23 = int_to_ptr.vmem [resolvable:$true] %s98_s23 }
  0x6a   :  { %p883_p7 = scmp.lt.u32.totalorder %s879_s26, %s1173_s7 }
  0x6c   :  { %p885_p8 = pnand %p883_p7, %p880_p6 }
  0x6e   :  { %888 = shalt.err (!%p885_p8)
}
  0x6f   :  { %s889_s17 = scalar_lea.vmem %s99_s23, 16  ;;  %s893_s5 = scalar_lea.vmem %s99_s23, 32 }
  0x70   :  { %p890_p9 = scmp.ne.s32.totalorder %s99_s23, %s889_s17  ;;  %p894_p10 = scmp.lt.s32.totalorder %s99_s23, %s99_s23 }
  0x71   :  { %p895_p11 = scmp.lt.s32.totalorder %s893_s5, %s889_s17 }
  0x73   :  { %p896_p12 = por %p895_p11, %p894_p10 }
  0x75   :  { %p897_p13 = pnand %p896_p12, %p890_p9 }
  0x77   :  { %900 = shalt.err (!%p897_p13)
}
  0x78   :  { %101 = dma.hbm_to_vmem [thread:$0]  %s1173_s7, 16, %s99_s23, [#allocation13]  }
  0x79   :  { %945 = dma.done.wait [#allocation4], 256  }
  0x7a   :  { %946 = vsyncadd [#allocation4], 4294967040 }
  0x7b   :  { %947 = dma.done.wait [#allocation7], 528  }
  0x7c   :  { %948 = vsyncadd [#allocation7], 4294966768 }
  0x7d   :  { %949 = dma.done.wait [#allocation10], 2064  }
  0x7e   :  { %950 = vsyncadd [#allocation10], 4294965232 }
  0x7f   :  { %951 = dma.done.wait [#allocation13], 2064  }
  0x80   :  { %952 = vsyncadd [#allocation13], 4294965232  ;;  %vm137_vm0 = vcmask 261120   ;;  %v126_v0 = vld [vmem:[#allocation6] sm:$0xff]  ;;  %v127_v1 = vld [vmem:[#allocation6 + $0x8] sm:$0xff]  ;;  %v221_v52 = vstv %s1166_s0  ;;  %s966_s0 = smov [#allocation15]  }
  0x81   :  { %v128_v2 = vld [vmem:[#allocation6 + $0x10] sm:$0xff]  ;;  %v650_v3 = vpack.c.bf16 %v127_v1, %v126_v0  ;;  %v129_v4 = vld [vmem:[#allocation6 + $0x18] sm:$0xff]  ;;  %v226_v7 = vld [vmem:[#allocation9] sm:$0xff]  ;;  %s482_s30 = sshll.u32 %s966_s0, 4  ;;  %s483_s30 = int_to_ptr.vmem [resolvable:$true] %s482_s30 }
  0x82   :  { %v124_v5 = vld [vmem:[#allocation3] sm:$0xff]  ;;  %v654_v6 = vpack.c.bf16 %v129_v4, %v128_v2  ;;  %v229_v11 = vld [vmem:[#allocation9 + $0x18] sm:$0xff]  ;;  %v230_v13 = vld [vmem:[#allocation9 + $0x20] sm:$0xff]  ;;  %s901_s11 = scalar_lea.vmem %s483_s30, 256  ;;  %p906_p1 = scmp.lt.s32.totalorder %s483_s30, %s483_s30 }
  0x83   :  { %577 = vmatprep.mubr.msk.f32.mxu0 %vm137_vm0, %v124_v5  ;;  %v227_v8 = vld [vmem:[#allocation9 + $0x8] sm:$0xff]  ;;  %v228_v9 = vld [vmem:[#allocation9 + $0x10] sm:$0xff]  ;;  %651 = vmatprep.subr.bf16.mxu0 %v650_v3  ;;  %v233_v18 = vld [vmem:[#allocation9 + $0x38] sm:$0xff]  ;;  %p902_p0 = scmp.ne.s32.totalorder %s483_s30, %s901_s11  ;;  %p907_p2 = scmp.lt.s32.totalorder %s901_s11, %s901_s11 }
  0x84   :  { %v658_v10 = vpack.c.bf16 %v227_v8, %v226_v7  ;;  %653 = vmatpush3.bf16.msra.mxu0 %v650_v3  ;;  %v662_v12 = vpack.c.bf16 %v229_v11, %v228_v9  ;;  %v231_v14 = vld [vmem:[#allocation9 + $0x28] sm:$0xff]  ;;  %v125_v16 = vld [vmem:[#allocation3 + $0x8] sm:$0xff]  ;;  %v234_v20 = vld [vmem:[#allocation9 + $0x40] sm:$0xff]  ;;  %v430_v11 = vlaneseq }
  0x85   :  { %655 = vmatprep.subr.bf16.mxu0 %v654_v6  ;;  %v666_v15 = vpack.c.bf16 %v231_v14, %v230_v13  ;;  %v232_v17 = vld [vmem:[#allocation9 + $0x30] sm:$0xff]  ;;  %v235_v21 = vld [vmem:[#allocation9 + $0x48] sm:$0xff]  ;;  %v237_v24 = vld [vmem:[#allocation9 + $0x58] sm:$0xff]  ;;  %p908_p3 = por %p907_p2, %p906_p1 }
  0x86   :  { %659 = vmatprep.subr.bf16.mxu1 %v658_v10  ;;  %v670_v19 = vpack.c.bf16 %v233_v18, %v232_v17  ;;  %v674_v22 = vpack.c.bf16 %v235_v21, %v234_v20  ;;  %v236_v23 = vld [vmem:[#allocation9 + $0x50] sm:$0xff]  ;;  %v238_v26 = vld [vmem:[#allocation9 + $0x60] sm:$0xff]  ;;  %v239_v27 = vld [vmem:[#allocation9 + $0x68] sm:$0xff] }
  0x87   :  { %661 = vmatpush3.bf16.msra.mxu1 %v658_v10  ;;  %v678_v25 = vpack.c.bf16 %v237_v24, %v236_v23  ;;  %v682_v28 = vpack.c.bf16 %v239_v27, %v238_v26  ;;  %v240_v29 = vld [vmem:[#allocation9 + $0x70] sm:$0xff]  ;;  %v241_v30 = vld [vmem:[#allocation9 + $0x78] sm:$0xff]  ;;  %v330_v32 = vld [vmem:[#allocation12] sm:$0xff]  ;;  %p909_p4 = pnand %p908_p3, %p902_p0 }
  0x88   :  { %663 = vmatprep.subr.bf16.mxu1 %v662_v12  ;;  %657 = vmatpush3.bf16.msra.mxu0 %v654_v6  ;;  %v686_v31 = vpack.c.bf16 %v241_v30, %v240_v29  ;;  %v331_v33 = vld [vmem:[#allocation12 + $0x8] sm:$0xff]  ;;  %v332_v34 = vld [vmem:[#allocation12 + $0x10] sm:$0xff]  ;;  %v333_v36 = vld [vmem:[#allocation12 + $0x18] sm:$0xff] }
  0x89   :  { %v690_v35 = vpack.c.bf16 %v331_v33, %v330_v32  ;;  %v694_v37 = vpack.c.bf16 %v333_v36, %v332_v34  ;;  %v334_v38 = vld [vmem:[#allocation12 + $0x20] sm:$0xff]  ;;  %v335_v39 = vld [vmem:[#allocation12 + $0x28] sm:$0xff]  ;;  %v336_v41 = vld [vmem:[#allocation12 + $0x30] sm:$0xff] }
  0x8a   :  { %v698_v40 = vpack.c.bf16 %v335_v39, %v334_v38  ;;  %v337_v42 = vld [vmem:[#allocation12 + $0x38] sm:$0xff]  ;;  %v338_v44 = vld [vmem:[#allocation12 + $0x40] sm:$0xff]  ;;  %v339_v45 = vld [vmem:[#allocation12 + $0x48] sm:$0xff] }
  0x8b   :  { %665 = vmatpush3.bf16.msra.mxu1 %v662_v12  ;;  %578 = vmatmul.mubr.msk.f32.vlgmr.msra.gmra.mrb[0].mxu0 %vm137_vm0, %v125_v16  ;;  %v702_v43 = vpack.c.bf16 %v337_v42, %v336_v41  ;;  %v706_v46 = vpack.c.bf16 %v339_v45, %v338_v44  ;;  %v340_v47 = vld [vmem:[#allocation12 + $0x50] sm:$0xff]  ;;  %v341_v48 = vld [vmem:[#allocation12 + $0x58] sm:$0xff]  ;;  %v342_v60 = vld [vmem:[#allocation12 + $0x60] sm:$0xff]  ;;  %v431_v12 = vand.u32 127, %v430_v11 }
  0x8c   :  { %667 = vmatprep.subr.bf16.mxu1 %v666_v15  ;;  %691 = vmatprep.subr.bf16.mxu0 %v690_v35  ;;  %v710_v49 = vpack.c.bf16 %v341_v48, %v340_v47  ;;  %v513_v50 = vld [vmem:[#allocation8] ss:$0 sm:$0xff]  ;;  %v343_v61 = vld [vmem:[#allocation12 + $0x68] sm:$0xff]  ;;  %v344_v63 = vld [vmem:[#allocation12 + $0x70] sm:$0xff] }
  0x8d   :  { %693 = vmatpush3.bf16.msra.mxu0 %v690_v35  ;;  %v714_v62 = vpack.c.bf16 %v343_v61, %v342_v60  ;;  %v345_v0 = vld [vmem:[#allocation12 + $0x78] sm:$0xff]  ;;  %v517_v13 = vld [vmem:[#allocation14] ss:$0 sm:$0xff]  ;;  %vm432_vm5 = vcmp.lt.s32.totalorder %v431_v12, 16 }
  0x8e   :  { %695 = vmatprep.subr.bf16.mxu0 %v694_v37  ;;  %v718_v1 = vpack.c.bf16 %v345_v0, %v344_v63  ;;  %v516_v2 = vld [vmem:[#allocation11] ss:$0 sm:$0xff] }
  0x8f   :  { %669 = vmatpush3.bf16.msra.mxu1 %v666_v15 }
  0x90   :  { %671 = vmatprep.subr.bf16.mxu1 %v670_v19 }
  0x91   :  { %697 = vmatpush3.bf16.msra.mxu0 %v694_v37 }
  0x92   :  { %699 = vmatprep.subr.bf16.mxu0 %v698_v40 }
  0x93   :  { %673 = vmatpush3.bf16.msra.mxu1 %v670_v19 }
  0x94   :  { %675 = vmatprep.subr.bf16.mxu1 %v674_v22 }
  0x95   :  { %701 = vmatpush3.bf16.msra.mxu0 %v698_v40 }
  0x96   :  { %703 = vmatprep.subr.bf16.mxu0 %v702_v43 }
  0x97   :  { %677 = vmatpush3.bf16.msra.mxu1 %v674_v22 }
  0x98   :  { %679 = vmatprep.subr.bf16.mxu1 %v678_v25 }
  0x99   :  { %705 = vmatpush3.bf16.msra.mxu0 %v702_v43 }
  0x9a   :  { %707 = vmatprep.subr.bf16.mxu0 %v706_v46 }
  0x9b   :  { %681 = vmatpush3.bf16.msra.mxu1 %v678_v25 }
  0x9c   :  { %683 = vmatprep.subr.bf16.mxu1 %v682_v28 }
  0x9d   :  { %709 = vmatpush3.bf16.msra.mxu0 %v706_v46 }
  0x9e   :  { %711 = vmatprep.subr.bf16.mxu0 %v710_v49 }
  0x9f   :  { %685 = vmatpush3.bf16.msra.mxu1 %v682_v28 }
  0xa0   :  { %687 = vmatprep.subr.bf16.mxu1 %v686_v31 }
  0xa1   :  { %713 = vmatpush3.bf16.msra.mxu0 %v710_v49 }
  0xa2   :  { %715 = vmatprep.subr.bf16.mxu0 %v714_v62 }
  0xa3   :  { %689 = vmatpush3.bf16.msra.mxu1 %v686_v31 }
  0xa5   :  { %717 = vmatpush3.bf16.msra.mxu0 %v714_v62 }
  0xa6   :  { %719 = vmatprep.subr.bf16.mxu0 %v718_v1 }
  0xa9   :  { %721 = vmatpush3.bf16.msra.mxu0 %v718_v1 }
 0x15e   :  { %v579_v51 = vpop.f32.mrb[0].mxu0 }
 0x15f   :  { %v216_v53 = vadd.f32 %v579_v51, %v513_v50  ;;  %v210_v54 = vpop.f32.mrb[1].mxu0 }
 0x160   :  { %v211_v55 = vadd.f32 %v513_v50, %v210_v54 }
 0x161   :  { %v223_v56 = vmul.f32 %v221_v52, %v216_v53  ;;  %vm220_vm2 = vcmp.gt.f32.partialorder %v216_v53, 0.0 }
 0x162   :  { %vm219_vm1 = vcmp.gt.f32.partialorder %v211_v55, 0.0  ;;  %v222_v57 = vmul.f32 %v221_v52, %v211_v55 }
 0x163   :  { %v225_v59 = vsel %vm220_vm2, %v216_v53, %v223_v56 }
 0x164   :  { %v224_v58 = vsel %vm219_vm1, %v211_v55, %v222_v57 }
 0x165   :  { %612 = vmatprep.mubr.f32.mxu1 %v224_v58 }
 0x166   :  { %613 = vmatmul.mubr.f32.vlgmr.msra.gmra.mrb[0].mxu1 %v225_v59 }
 0x239   :  { %v614_v3 = vpop.f32.mrb[0].mxu1 }
 0x23a   :  { %v321_v4 = vadd.f32 %v614_v3, %v516_v2  ;;  %v315_v5 = vpop.f32.mrb[1].mxu1 }
 0x23b   :  { %v316_v6 = vadd.f32 %v516_v2, %v315_v5 }
 0x23c   :  { %v327_v7 = vmul.f32 %v321_v4, %v221_v52  ;;  %vm325_vm3 = vcmp.gt.f32.partialorder %v321_v4, 0.0 }
 0x23d   :  { %v326_v8 = vmul.f32 %v316_v6, %v221_v52  ;;  %vm324_vm4 = vcmp.gt.f32.partialorder %v316_v6, 0.0 }
 0x23e   :  { %v329_v10 = vsel %vm325_vm3, %v321_v4, %v327_v7 }
 0x23f   :  { %v328_v9 = vsel %vm324_vm4, %v316_v6, %v326_v8 }
 0x240   :  { %647 = vmatprep.mubr.f32.mxu0 %v328_v9 }
 0x241   :  { %648 = vmatmul.mubr.f32.vlgmr.msra.gmra.mrb[2].mxu0 %v329_v10 }
 0x314   :  { %v649_v14 = vpop.f32.mrb[2].mxu0 }
 0x315   :  { %v425_v15 = vadd.f32 %v649_v14, %v517_v13  ;;  %v419_v16 = vpop.f32.mrb[3].mxu0 }
 0x316   :  { %v420_v17 = vadd.f32 %v517_v13, %v419_v16 }
 0x317   :  { %429 = vst [vmem:[#allocation15 + $0x8] sm:$0xff] %v425_v15  ;;  %v434_v19 = vsel %vm432_vm5, %v425_v15, -inf }
 0x318   :  { %428 = vst [vmem:[#allocation15] sm:$0xff] %v420_v17  ;;  %v433_v18 = vsel %vm432_vm5, %v420_v17, -inf }
 0x319   :  { %435 = vmax.xlane.f32.xlu0 %v433_v18 }
 0x31d   :  { %437 = vmax.xlane.f32.xlu0 %v434_v19 }
 0x3a6   :  { %v436_v20 = vpop.xlane.xlu0 %435 }
 0x3a7   :  { %v439_v21 = vsub.f32 %v420_v17, %v436_v20 }
 0x3a9   :  { %v441_v22 = vmul.f32 1.442695, %v439_v21 }
 0x3aa   :  { %v438_v23 = vpop.xlane.xlu0 %437 }
 0x3ab   :  { %735 = vpow2.f32 %v441_v22  ;;  %v440_v24 = vsub.f32 %v425_v15, %v438_v23 }
 0x3ad   :  { %v443_v25 = vmul.f32 1.442695, %v440_v24 }
 0x3af   :  { %737 = vpow2.f32 %v443_v25 }
 0x3b5   :  { %v736_v26 = vpop.eup %735 }
 0x3b6   :  { %v445_v27 = vsel %vm432_vm5, %v736_v26, 0.0 }
 0x3b7   :  { %447 = vadd.xlane.f32.xlu1 %v445_v27 }
 0x3b9   :  { %v738_v28 = vpop.eup %737 }
 0x3ba   :  { %v446_v29 = vsel %vm432_vm5, %v738_v28, 0.0 }
 0x3bb   :  { %449 = vadd.xlane.f32.xlu1 %v446_v29 }
 0x444   :  { %v448_v30 = vpop.xlane.xlu1 %447 }
 0x445   :  { %739 = vrcp.f32 %v448_v30 }
 0x448   :  { %v450_v31 = vpop.xlane.xlu1 %449 }
 0x449   :  { %741 = vrcp.f32 %v450_v31 }
 0x44f   :  { %v740_v32 = vpop.eup %739 }
 0x450   :  { %v453_v33 = vmul.f32 %v740_v32, %v445_v27 }
 0x452   :  { %v455_v34 = vmul.f32 %v453_v33, %v453_v33 }
 0x453   :  { %v742_v35 = vpop.eup %741 }
 0x454   :  { %457 = vadd.xlane.f32.xlu0 %v455_v34  ;;  %v454_v36 = vmul.f32 %v742_v35, %v446_v29 }
 0x456   :  { %v456_v37 = vmul.f32 %v454_v36, %v454_v36 }
 0x458   :  { %459 = vadd.xlane.f32.xlu1 %v456_v37 }
 0x459   :  { %912 = shalt.err (!%p909_p4)
}
 0x45a   :  { %s913_s10 = scalar_lea.hbm %s1174_s8, 256 }
 0x45b   :  { %p914_p5 = scmp.ne.s32.totalorder %s1174_s8, %s913_s10  ;;  %p917_p6 = scmp.lt.u32.totalorder %s913_s10, %s1174_s8 }
 0x45d   :  { %p919_p7 = pnand %p917_p6, %p914_p5 }
 0x45f   :  { %922 = shalt.err (!%p919_p7)
}
 0x460   :  { %488 = dma.vmem_to_hbm [thread:$0]  %s483_s30, 256, %s1174_s8, [#allocation5], %s959_s21, %s959_s21, %s960_s22  }
 0x461   :  { %s967_s19 = smov [#allocation16]  }
 0x462   :  { %s494_s23 = sshll.u32 %s967_s19, 4  ;;  %s495_s23 = int_to_ptr.vmem [resolvable:$true] %s494_s23 }
 0x463   :  { %s923_s24 = scalar_lea.vmem %s495_s23, 128  ;;  %p928_p9 = scmp.lt.s32.totalorder %s495_s23, %s495_s23 }
 0x464   :  { %p924_p8 = scmp.ne.s32.totalorder %s495_s23, %s923_s24  ;;  %p929_p10 = scmp.lt.s32.totalorder %s923_s24, %s923_s24 }
 0x466   :  { %p930_p11 = por %p929_p10, %p928_p9 }
 0x468   :  { %p931_p12 = pnand %p930_p11, %p924_p8 }
 0x4e1   :  { %v458_v38 = vpop.xlane.xlu0 %457 }
 0x4e2   :  { %v461_v39 = vmax.f32 %v458_v38, 1e-18 }
 0x4e4   :  { %743 = vrsqrt.f32 %v461_v39 }
 0x4e5   :  { %v460_v40 = vpop.xlane.xlu1 %459 }
 0x4e6   :  { %v462_v41 = vmax.f32 %v460_v40, 1e-18 }
 0x4e8   :  { %745 = vrsqrt.f32 %v462_v41 }
 0x4ee   :  { %v744_v42 = vpop.eup %743 }
 0x4ef   :  { %v465_v44 = vmul.f32 %v744_v42, %v453_v33 }
 0x4f2   :  { %v746_v43 = vpop.eup %745 }
 0x4f3   :  { %v466_v45 = vmul.f32 %v746_v43, %v454_v36 }
 0x4f5   :  { %v525_v46 = vpack.c.bf16 %v466_v45, %v465_v44 }
 0x4f7   :  { %526 = vst [vmem:[#allocation16] sm:$0xff] %v525_v46  }
 0x4f8   :  { %934 = shalt.err (!%p931_p12)
}
 0x4f9   :  { %s935_s22 = scalar_lea.hbm %s1175_s9, 128 }
 0x4fa   :  { %p936_p13 = scmp.ne.s32.totalorder %s1175_s9, %s935_s22  ;;  %p939_p0 = scmp.lt.u32.totalorder %s935_s22, %s1175_s9 }
 0x4fc   :  { %p941_p1 = pnand %p939_p0, %p936_p13 }
 0x4fe   :  { %944 = shalt.err (!%p941_p1)
}
 0x4ff   :  { %s968_s27 = smov 64   ;;  %s969_s1 = smov 4  }
 0x500   :  { %500 = dma.vmem_to_hbm [thread:$0]  %s495_s23, 128, %s1175_s9, [#allocation17], %s968_s27, %s968_s27, %s969_s1  }
 0x501   :  { %953 = dma.done.wait [#allocation5], 256  }
 0x502   :  { %954 = vsyncadd [#allocation5], 4294967040 }
 0x503   :  { %955 = dma.done.wait [#allocation17], 128  }
 0x504   :  { %956 = vsyncadd [#allocation17], 4294967168 }
 0x505   :  { %507 = vsyncpa [#allocation4], 1 }
 0x506   :  { %508 = vsyncpa [#allocation7], 1 }
 0x507   :  { %509 = vsyncpa [#allocation10], 1 }
 0x508   :  { %510 = vsyncpa [#allocation13], 1 }
 0x509   :  { %511 = vsyncpa [#allocation5], 1 }
 0x50a   :  { %512 = vsyncpa [#allocation17], 1 }

</bundles_post_ra>
